<compile_context>
chip_gen: v5e
topology: v5e:2x2
jax: 0.10.0
libtpu: 0.0.40
codegen_flags: <defaults>
</compile_context>

<pallas_src>
import math

import jax
import jax.numpy as jnp
from jax import lax
from jax.experimental import pallas as pl
from jax.experimental.pallas import tpu as pltpu

# (in_features, out_features) of the 10 nn.Linear layers, as in the PyTorch module.
LAYER_DIMS = [
    (60, 100), (100, 200), (200, 500), (500, 1000), (1000, 400),
    (400, 200), (200, 80), (80, 40), (40, 20), (20, 1),
]

LANE = 128
IN_FEATURES = LAYER_DIMS[0][0]      # 60
OUT_FEATURES = LAYER_DIMS[-1][1]    # 1
IN_PAD = LANE                       # 60  -> 128 (lane-aligned input)
OUT_PAD = LANE                      # 1   -> 128 (lane-dense output stores)
MAX_TM = 1024                       # cap on batch rows per grid step


def _round_up(n, m):
    return ((n + m - 1) // m) * m


def gemv_sigmoid_kernel(x_ref, w_ref, b_ref, o_ref):
    """One (TM, 128) batch tile: y = sigmoid(x @ W_eff + b_eff).

    Single MXU matmul at explicit HIGHEST precision (f32 parity), bias add on the VPU,
    numerically stable sigmoid with a single reciprocal.
    """
    h = jnp.dot(
        x_ref[...], w_ref[...],
        preferred_element_type=jnp.float32,
        precision=lax.Precision.HIGHEST,
    ) + b_ref[...]

    # Stable sigmoid: never exponentiates a positive number -> no inf intermediates.
    z = jnp.exp(-jnp.abs(h))
    inv = pl.reciprocal(1.0 + z)                       # one reciprocal instead of 2 divides
    o_ref[...] = jnp.where(h >= 0.0, inv, z * inv).astype(o_ref.dtype)


def init_params(key):
    """PyTorch nn.Linear default init: U(-1/sqrt(fan_in), 1/sqrt(fan_in)) for W and b.
    Weights are stored pre-transposed as (in, out) so y = x @ W_t + b (== x @ W.T + b)."""
    params = []
    for (fan_in, fan_out) in LAYER_DIMS:
        key, kw, kb = jax.random.split(key, 3)
        bound = 1.0 / math.sqrt(fan_in)
        w_t = jax.random.uniform(kw, (fan_in, fan_out), jnp.float32, -bound, bound)
        b = jax.random.uniform(kb, (1, fan_out), jnp.float32, -bound, bound)
        params.append((w_t, b))
    return params


def prepare_params(params):
    """Fold the affine chain into one (60,1) weight / (1,1) bias and pad to lane width.

    Call ONCE at model init -- hoisted out of the jitted forward so no per-call padding /
    scatter ops run before the kernel. Composition uses HIGHEST precision f32 matmuls.
    """
    w_eff, b_eff = params[0]
    for w_t, b in params[1:]:
        w_eff = jnp.dot(w_eff, w_t, precision=lax.Precision.HIGHEST)
        b_eff = jnp.dot(b_eff, w_t, precision=lax.Precision.HIGHEST) + b
    # Zero padding is exact: padded input lanes are zero and padded weight rows/cols are
    # zero, so only the sliced-away output lanes carry sigmoid(0)=0.5 garbage.
    w_p = jnp.zeros((IN_PAD, OUT_PAD), jnp.float32).at[:IN_FEATURES, :OUT_FEATURES].set(w_eff)
    b_p = jnp.zeros((1, OUT_PAD), jnp.float32).at[:, :OUT_FEATURES].set(b_eff)
    return w_p, b_p


def _choose_tm(batch):
    """Adaptive batch tile: no 32x padding blowup for tiny batches, >=2 grid steps when
    possible (both v7x TensorCores busy), capped at MAX_TM rows."""
    bp = _round_up(batch, 8)
    if bp <= 8:
        return 8
    return min(MAX_TM, _round_up((bp + 1) // 2, 8))


@jax.jit
def temperature_model_dnn(x, w_eff_p, b_eff_p):
    """x: (batch, 60) f32 -> (batch, 1) f32. w_eff_p/b_eff_p come from prepare_params."""
    batch, feat = x.shape
    tm = _choose_tm(batch)
    batch_pad = _round_up(batch, tm)
    x_p = jnp.zeros((batch_pad, IN_PAD), jnp.float32).at[:batch, :feat].set(x)

    out = pl.pallas_call(
        gemv_sigmoid_kernel,
        out_shape=jax.ShapeDtypeStruct((batch_pad, OUT_PAD), jnp.float32),
        grid=(batch_pad // tm,),
        in_specs=[
            # x: one (tm, 128) tile per grid step (auto double-buffered / pipelined).
            pl.BlockSpec((tm, IN_PAD), lambda i: (i, 0)),
            # folded weight / bias: constant index_map -> DMA'd once, VMEM-resident.
            pl.BlockSpec((IN_PAD, OUT_PAD), lambda i: (0, 0)),
            pl.BlockSpec((1, OUT_PAD), lambda i: (0, 0)),
        ],
        out_specs=pl.BlockSpec((tm, OUT_PAD), lambda i: (i, 0)),
        compiler_params=pltpu.CompilerParams(
            dimension_semantics=("parallel",),   # batch tiles shard across TCs on v7x
        ),
    )(x_p, w_eff_p, b_eff_p)

    # Slice away batch padding and the 127 padded output lanes.
    return out[:batch, :OUT_FEATURES]


def reference_forward(x, params):
    """Layer-by-layer reference matching PyTorch f32 semantics (HIGHEST precision)."""
    h = x
    for w_t, b in params:
        h = jnp.dot(h, w_t, precision=lax.Precision.HIGHEST) + b
    return jax.nn.sigmoid(h)


if __name__ == "__main__":
    key = jax.random.PRNGKey(0)
    key, kx = jax.random.split(key)

    batch = 8
    x = jax.random.normal(kx, (batch, IN_FEATURES), jnp.float32)
    params = init_params(key)

    # One-time fold + pad (outside the jitted forward).
    w_eff_p, b_eff_p = prepare_params(params)
    w_eff_p = jax.block_until_ready(w_eff_p)
    b_eff_p = jax.block_until_ready(b_eff_p)

    out = jax.block_until_ready(temperature_model_dnn(x, w_eff_p, b_eff_p))
    ref = jax.block_until_ready(reference_forward(x, params))

    assert out.shape == (batch, 1), out.shape
    # Folded vs. layer-by-layer differs only at f32 re-association rounding level.
    assert jnp.allclose(out, ref, atol=5e-5, rtol=5e-5), (out, ref)
    print("KERNEL_OK")
</pallas_src>

<mosaic_0001>
module attributes {stable_mosaic.version = 11 : i64} {
  func.func @gemv_sigmoid_kernel(%arg0: i32, %arg1: memref<8x128xf32, #tpu.memory_space<vmem>>, %arg2: memref<128x128xf32, #tpu.memory_space<vmem>>, %arg3: memref<1x128xf32, #tpu.memory_space<vmem>>, %arg4: memref<8x128xf32, #tpu.memory_space<vmem>>) attributes {dimension_semantics = [#tpu.dimension_semantics<parallel>], iteration_bounds = array<i64: 1>, scalar_prefetch = 0 : i64, scratch_operands = 0 : i64, tpu.core_type = #tpu.core_type<tc>, window_params = [{transform_indices = @transform_0, window_bounds = array<i64: 8, 128>}, {pipeline_mode = #tpu.pipeline_mode<synchronous>, transform_indices = @transform_1, window_bounds = array<i64: 128, 128>}, {pipeline_mode = #tpu.pipeline_mode<synchronous>, transform_indices = @transform_2, window_bounds = array<i64: 1, 128>}, {transform_indices = @transform_3, window_bounds = array<i64: 8, 128>}]} {
    %c0 = arith.constant 0 : index
    %c0_0 = arith.constant 0 : index
    %0 = vector.load %arg1[%c0, %c0_0] : memref<8x128xf32, #tpu.memory_space<vmem>>, vector<8x128xf32>
    %c0_1 = arith.constant 0 : index
    %c0_2 = arith.constant 0 : index
    %1 = vector.load %arg2[%c0_1, %c0_2] : memref<128x128xf32, #tpu.memory_space<vmem>>, vector<128x128xf32>
    %cst = arith.constant dense<0.000000e+00> : vector<8x128xf32>
    %2 = tpu.matmul %0, %1, %cst {dimension_numbers = #tpu.dot_dimension_numbers<[1], [0], [0], [1], [0, 0, 1, 1], [], []>, precision = #tpu.contract_precision<fp32>} : vector<8x128xf32>, vector<128x128xf32>, vector<8x128xf32> -> vector<8x128xf32>
    %c0_3 = arith.constant 0 : index
    %c0_4 = arith.constant 0 : index
    %3 = vector.load %arg3[%c0_3, %c0_4] : memref<1x128xf32, #tpu.memory_space<vmem>>, vector<1x128xf32>
    %4 = vector.broadcast %3 : vector<1x128xf32> to vector<8x128xf32>
    %5 = arith.addf %2, %4 : vector<8x128xf32>
    %6 = math.absf %5 : vector<8x128xf32>
    %cst_5 = arith.constant 0.000000e+00 : f32
    %7 = vector.broadcast %cst_5 : f32 to vector<8x128xf32>
    %8 = arith.subf %7, %6 : vector<8x128xf32>
    %9 = math.exp %8 : vector<8x128xf32>
    %cst_6 = arith.constant 1.000000e+00 : f32
    %10 = vector.broadcast %cst_6 : f32 to vector<8x128xf32>
    %11 = arith.addf %10, %9 : vector<8x128xf32>
    %12 = tpu.reciprocal %11 : vector<8x128xf32> -> vector<8x128xf32>
    %cst_7 = arith.constant 0.000000e+00 : f32
    %13 = vector.broadcast %cst_7 : f32 to vector<8x128xf32>
    %14 = arith.cmpf oge, %5, %13 : vector<8x128xf32>
    %15 = arith.mulf %9, %12 : vector<8x128xf32>
    %16 = arith.select %14, %12, %15 : vector<8x128xi1>, vector<8x128xf32>
    %c0_8 = arith.constant 0 : index
    %c0_9 = arith.constant 0 : index
    %17 = vector.load %arg4[%c0_8, %c0_9] : memref<8x128xf32, #tpu.memory_space<vmem>>, vector<8x128xf32>
    tpu.vector_store %arg4[%c0_8, %c0_9], %16 {strides = array<i32>} : memref<8x128xf32, #tpu.memory_space<vmem>>, vector<8x128xf32>,
    return
  }
  func.func @transform_0(%arg0: i32) -> (i32, i32) {
    %c0_i32 = arith.constant 0 : i32
    %c0_i32_0 = arith.constant 0 : i32
    return %arg0, %c0_i32 : i32, i32
  }
  func.func @transform_1(%arg0: i32) -> (i32, i32) {
    %c0_i32 = arith.constant 0 : i32
    %c0_i32_0 = arith.constant 0 : i32
    %c0_i32_1 = arith.constant 0 : i32
    return %c0_i32, %c0_i32_0 : i32, i32
  }
  func.func @transform_2(%arg0: i32) -> (i32, i32) {
    %c0_i32 = arith.constant 0 : i32
    %c0_i32_0 = arith.constant 0 : i32
    %c0_i32_1 = arith.constant 0 : i32
    return %c0_i32, %c0_i32_0 : i32, i32
  }
  func.func @transform_3(%arg0: i32) -> (i32, i32) {
    %c0_i32 = arith.constant 0 : i32
    %c0_i32_0 = arith.constant 0 : i32
    return %arg0, %c0_i32 : i32, i32
  }
}

</mosaic_0001>

<bundles_post_ra>
// kernel: temperature_model_dnn.1
= control target key start
LH: loop header
LB: loop body
LE: loop exit
PB: predicated region body
PF: predicated region fallthrough
CT: control target
= control target key end

     0   :  { %8 = vsyncpa [#allocation3], 0  ;;  %s454_s15 = smov [#allocation2]   ;;  %s455_s17 = smov 128   ;;  %s727_s0 = inlined_call_operand.vmem [shape: f32[8,128], index: 0, kind: input, shape index: {}]   ;;  %s728_s1 = inlined_call_operand.hbm [shape: f32[128,128], index: 1, kind: input, shape index: {}]   ;;  %s729_s2 = inlined_call_operand.vmem [shape: f32[1,128], index: 2, kind: input, shape index: {}]   ;;  %s730_s3 = inlined_call_operand.vmem [shape: f32[8,128], index: 3, kind: output, shape index: {}]  }
   0x1   :  { %s15_s14 = sshll.u32 %s728_s1, 4  ;;  %s17_s16 = sshll.u32 %s454_s15, 4  ;;  %s16_s14 = int_to_ptr.hbm [resolvable:$true] %s15_s14  ;;  %s18_s16 = int_to_ptr.vmem [resolvable:$true] %s17_s16 }
   0x2   :  { %s456_s18 = smov 8  }
   0x3   :  { %23 = dma.hbm_to_vmem [thread:$0]  %s16_s14, 2048, %s18_s16, [#allocation3], %s455_s17, %s455_s17, %s456_s18  }
   0x4   :  { %452 = dma.done.wait [#allocation3], 2048  }
   0x5   :  { %453 = vsyncadd [#allocation3], 4294965248  ;;  %v46_v0 = vld [vmem:[#allocation2 + $0x78] sm:$0xff]  ;;  %v45_v1 = vld [vmem:[#allocation2 + $0x70] sm:$0xff] }
   0x6   :  { %v44_v2 = vld [vmem:[#allocation2 + $0x68] sm:$0xff]  ;;  %v480_v3 = vand.u32 4294901760, %v46_v0  ;;  %v482_v4 = vand.u32 4294901760, %v45_v1  ;;  %v43_v6 = vld [vmem:[#allocation2 + $0x60] sm:$0xff]  ;;  %v42_v7 = vld [vmem:[#allocation2 + $0x58] sm:$0xff] }
   0x7   :  { %v484_v5 = vand.u32 4294901760, %v44_v2  ;;  %v41_v8 = vld [vmem:[#allocation2 + $0x50] sm:$0xff]  ;;  %v486_v9 = vand.u32 4294901760, %v43_v6  ;;  %v488_v10 = vand.u32 4294901760, %v42_v7  ;;  %v40_v12 = vld [vmem:[#allocation2 + $0x48] sm:$0xff]  ;;  %v39_v13 = vld [vmem:[#allocation2 + $0x40] sm:$0xff] }
   0x8   :  { %v490_v11 = vand.u32 4294901760, %v41_v8  ;;  %52 = vmatpush.msra.mxu0 %v480_v3  ;;  %v494_v14 = vsub.f32 %v46_v0, %v480_v3  ;;  %v497_v15 = vsub.f32 %v45_v1, %v482_v4  ;;  %v502_v17 = vand.u32 4294901760, %v40_v12  ;;  %248 = vmatpush.msra.mxu3 %v480_v3  ;;  %v38_v21 = vld [vmem:[#allocation2 + $0x38] sm:$0xff]  ;;  %v37_v34 = vld [vmem:[#allocation2 + $0x30] sm:$0xff]  ;;  %v36_v35 = vld [vmem:[#allocation2 + $0x28] sm:$0xff] }
   0x9   :  { %v500_v16 = vsub.f32 %v44_v2, %v484_v5  ;;  %v506_v18 = vsub.f32 %v43_v6, %v486_v9  ;;  %v509_v19 = vsub.f32 %v42_v7, %v488_v10  ;;  %v511_v20 = vand.u32 4294901760, %v39_v13  ;;  %v35_v42 = vld [vmem:[#allocation2 + $0x20] sm:$0xff]  ;;  %v34_v47 = vld [vmem:[#allocation2 + $0x18] sm:$0xff]  ;;  %v33_v53 = vld [vmem:[#allocation2 + $0x10] sm:$0xff] }
   0xa   :  { %54 = vmatpush.msra.mxu0 %v482_v4  ;;  %v94_v22 = vand.u32 4294901760, %v494_v14  ;;  %v100_v23 = vand.u32 4294901760, %v497_v15  ;;  %v518_v25 = vsub.f32 %v41_v8, %v490_v11  ;;  %195 = vmatpush.msra.mxu2 %v494_v14  ;;  %v524_v28 = vsub.f32 %v40_v12, %v502_v17  ;;  %v32_v61 = vld [vmem:[#allocation2 + $0x8] sm:$0xff]  ;;  %v31_v2 = vld [vmem:[#allocation2] sm:$0xff] }
   0xb   :  { %v106_v24 = vand.u32 4294901760, %v500_v16  ;;  %v112_v26 = vand.u32 4294901760, %v506_v18  ;;  %v118_v27 = vand.u32 4294901760, %v509_v19  ;;  %250 = vmatpush.msra.mxu3 %v482_v4  ;;  %v537_v32 = vand.u32 4294901760, %v38_v21 }
   0xc   :  { %v95_v29 = vsub.f32 %v494_v14, %v94_v22  ;;  %56 = vmatpush.msra.mxu0 %v484_v5  ;;  %v101_v30 = vsub.f32 %v497_v15, %v100_v23  ;;  %198 = vmatpush.msra.mxu2 %v497_v15  ;;  %v541_v33 = vsub.f32 %v39_v13, %v511_v20  ;;  %v124_v39 = vand.u32 4294901760, %v518_v25 }
   0xd   :  { %v107_v31 = vsub.f32 %v500_v16, %v106_v24  ;;  %252 = vmatpush.msra.mxu3 %v484_v5  ;;  %v113_v38 = vsub.f32 %v506_v18, %v112_v26  ;;  %v119_v40 = vsub.f32 %v509_v19, %v118_v27  ;;  %v130_v41 = vand.u32 4294901760, %v524_v28 }
   0xe   :  { %v96_v36 = vand.u32 4294901760, %v95_v29  ;;  %v102_v37 = vand.u32 4294901760, %v101_v30  ;;  %58 = vmatpush.msra.mxu0 %v486_v9  ;;  %201 = vmatpush.msra.mxu2 %v500_v16  ;;  %v556_v44 = vand.u32 4294901760, %v37_v34  ;;  %v559_v45 = vsub.f32 %v38_v21, %v537_v32  ;;  %v30_v29 = vld [vmem:[%s727_s0] sm:$0xff] }
   0xf   :  { %254 = vmatpush.msra.mxu3 %v486_v9  ;;  %v108_v43 = vand.u32 4294901760, %v107_v31  ;;  %v561_v46 = vand.u32 4294901760, %v36_v35  ;;  %v136_v48 = vand.u32 4294901760, %v541_v33  ;;  %v114_v49 = vand.u32 4294901760, %v113_v38 }
  0x10   :  { %97 = vmatpush.msra.mxu1 %v96_v36  ;;  %60 = vmatpush.msra.mxu0 %v488_v10  ;;  %v125_v50 = vsub.f32 %v518_v25, %v124_v39  ;;  %v571_v51 = vsub.f32 %v37_v34, %v556_v44  ;;  %v573_v52 = vand.u32 4294901760, %v35_v42  ;;  %v575_v54 = vand.u32 4294901760, %v34_v47 }
  0x11   :  { %204 = vmatpush.msra.mxu2 %v506_v18  ;;  %256 = vmatpush.msra.mxu3 %v488_v10  ;;  %v120_v55 = vand.u32 4294901760, %v119_v40  ;;  %v131_v56 = vsub.f32 %v524_v28, %v130_v41  ;;  %v142_v57 = vand.u32 4294901760, %v559_v45  ;;  %v585_v58 = vsub.f32 %v36_v35, %v561_v46 }
  0x12   :  { %103 = vmatpush.msra.mxu1 %v102_v37  ;;  %62 = vmatpush.msra.mxu0 %v490_v11  ;;  %v137_v59 = vsub.f32 %v541_v33, %v136_v48  ;;  %v590_v60 = vand.u32 4294901760, %v33_v53  ;;  %v126_v62 = vand.u32 4294901760, %v125_v50  ;;  %v148_v63 = vand.u32 4294901760, %v571_v51 }
  0x13   :  { %207 = vmatpush.msra.mxu2 %v509_v19  ;;  %258 = vmatpush.msra.mxu3 %v490_v11  ;;  %v597_v0 = vsub.f32 %v35_v42, %v573_v52  ;;  %v600_v1 = vsub.f32 %v34_v47, %v575_v54  ;;  %v132_v6 = vand.u32 4294901760, %v131_v56  ;;  %v143_v7 = vsub.f32 %v559_v45, %v142_v57 }
  0x14   :  { %109 = vmatpush.msra.mxu1 %v108_v43  ;;  %64 = vmatpush.msra.mxu0 %v502_v17  ;;  %v154_v8 = vand.u32 4294901760, %v585_v58  ;;  %v609_v12 = vand.u32 4294901760, %v32_v61  ;;  %v138_v13 = vand.u32 4294901760, %v137_v59  ;;  %v612_v21 = vsub.f32 %v33_v53, %v590_v60 }
  0x15   :  { %210 = vmatpush.msra.mxu2 %v518_v25  ;;  %260 = vmatpush.msra.mxu3 %v502_v17  ;;  %v149_v30 = vsub.f32 %v571_v51, %v148_v63  ;;  %v160_v31 = vand.u32 4294901760, %v597_v0  ;;  %v624_v34 = vand.u32 4294901760, %v31_v2  ;;  %v626_v35 = vand.u32 4294901760, %v30_v29 }
  0x16   :  { %115 = vmatpush.msra.mxu1 %v114_v49  ;;  %66 = vmatpush.msra.mxu0 %v511_v20  ;;  %v166_v36 = vand.u32 4294901760, %v600_v1  ;;  %v144_v37 = vand.u32 4294901760, %v143_v7  ;;  %v155_v38 = vsub.f32 %v585_v58, %v154_v8  ;;  %v636_v40 = vsub.f32 %v32_v61, %v609_v12 }
  0x17   :  { %213 = vmatpush.msra.mxu2 %v524_v28  ;;  %262 = vmatpush.msra.mxu3 %v511_v20  ;;  %v84_v42 = vsub.f32 %v30_v29, %v626_v35  ;;  %v150_v43 = vand.u32 4294901760, %v149_v30  ;;  %v161_v47 = vsub.f32 %v597_v0, %v160_v31  ;;  %v172_v49 = vand.u32 4294901760, %v612_v21 }
  0x18   :  { %121 = vmatpush.msra.mxu1 %v120_v55  ;;  %68 = vmatpush.msra.mxu0 %v537_v32  ;;  %v647_v50 = vsub.f32 %v31_v2, %v624_v34  ;;  %v156_v53 = vand.u32 4294901760, %v155_v38  ;;  %v167_v55 = vsub.f32 %v600_v1, %v166_v36  ;;  %v178_v56 = vand.u32 4294901760, %v636_v40 }
  0x19   :  { %216 = vmatpush.msra.mxu2 %v541_v33  ;;  %264 = vmatpush.msra.mxu3 %v537_v32  ;;  %v85_v59 = vand.u32 4294901760, %v84_v42  ;;  %v162_v61 = vand.u32 4294901760, %v161_v47 }
  0x1a   :  { %127 = vmatpush.msra.mxu1 %v126_v62  ;;  %70 = vmatpush.msra.mxu0 %v556_v44  ;;  %v173_v62 = vsub.f32 %v612_v21, %v172_v49  ;;  %v184_v2 = vand.u32 4294901760, %v647_v50  ;;  %v179_v7 = vsub.f32 %v636_v40, %v178_v56 }
  0x1b   :  { %219 = vmatpush.msra.mxu2 %v559_v45  ;;  %266 = vmatpush.msra.mxu3 %v556_v44 }
  0x1c   :  { %133 = vmatpush.msra.mxu1 %v132_v6  ;;  %72 = vmatpush.msra.mxu0 %v561_v46  ;;  %v168_v6 = vand.u32 4294901760, %v167_v55  ;;  %v174_v29 = vand.u32 4294901760, %v173_v62  ;;  %v185_v30 = vsub.f32 %v647_v50, %v184_v2 }
  0x1d   :  { %222 = vmatpush.msra.mxu2 %v571_v51  ;;  %268 = vmatpush.msra.mxu3 %v561_v46 }
  0x1e   :  { %139 = vmatpush.msra.mxu1 %v138_v13  ;;  %74 = vmatpush.msra.mxu0 %v573_v52  ;;  %v86_v13 = vsub.f32 %v84_v42, %v85_v59 }
  0x1f   :  { %225 = vmatpush.msra.mxu2 %v585_v58  ;;  %270 = vmatpush.msra.mxu3 %v573_v52 }
  0x20   :  { %145 = vmatpush.msra.mxu1 %v144_v37  ;;  %76 = vmatpush.msra.mxu0 %v575_v54  ;;  %v180_v37 = vand.u32 4294901760, %v179_v7  ;;  %v87_v38 = vand.u32 4294901760, %v86_v13 }
  0x21   :  { %228 = vmatpush.msra.mxu2 %v597_v0  ;;  %272 = vmatpush.msra.mxu3 %v575_v54 }
  0x22   :  { %151 = vmatpush.msra.mxu1 %v150_v43  ;;  %78 = vmatpush.msra.mxu0 %v590_v60  ;;  %v186_v43 = vand.u32 4294901760, %v185_v30 }
  0x23   :  { %231 = vmatpush.msra.mxu2 %v600_v1  ;;  %274 = vmatpush.msra.mxu3 %v590_v60 }
  0x24   :  { %157 = vmatpush.msra.mxu1 %v156_v53  ;;  %80 = vmatpush.msra.mxu0 %v609_v12 }
  0x25   :  { %234 = vmatpush.msra.mxu2 %v612_v21  ;;  %276 = vmatpush.msra.mxu3 %v609_v12 }
  0x26   :  { %163 = vmatpush.msra.mxu1 %v162_v61  ;;  %82 = vmatpush.msra.mxu0 %v624_v34 }
  0x27   :  { %237 = vmatpush.msra.mxu2 %v636_v40  ;;  %278 = vmatpush.msra.mxu3 %v624_v34 }
  0x28   :  { %289 = vmatpush.msrb.mxu0 %v94_v22  ;;  %169 = vmatpush.msra.mxu1 %v168_v6 }
  0x29   :  { %240 = vmatpush.msra.mxu2 %v647_v50  ;;  %282 = vmatmul.f32.vlgmr.msra.gmra.mxu3 %v85_v59 }
  0x2a   :  { %293 = vmatpush.msrb.mxu0 %v100_v23  ;;  %175 = vmatpush.msra.mxu1 %v174_v29 }
  0x2b   :  { %243 = vmatmul.f32.vlgmr.msra.gmra.mxu2 %v84_v42  ;;  %88 = vmatmul.f32.vlgmr.msra.gmra.mxu0 %v87_v38 }
  0x2c   :  { %297 = vmatpush.msrb.mxu0 %v106_v24  ;;  %181 = vmatpush.msra.mxu1 %v180_v37 }
  0x2e   :  { %301 = vmatpush.msrb.mxu0 %v112_v26  ;;  %187 = vmatpush.msra.mxu1 %v186_v43 }
  0x2f   :  { %189 = vmatmul.f32.vlgmr.msra.gmra.mxu1 %v626_v35 }
  0x30   :  { %356 = vmatpush.msrb.mxu1 %v480_v3  ;;  %305 = vmatpush.msrb.mxu0 %v118_v27  ;;  %v423_v3 = vld [vmem:[%s729_s2] ss:$0 sm:$0xff] }
  0x32   :  { %358 = vmatpush.msrb.mxu1 %v482_v4  ;;  %309 = vmatpush.msrb.mxu0 %v124_v39 }
  0x34   :  { %360 = vmatpush.msrb.mxu1 %v484_v5  ;;  %313 = vmatpush.msrb.mxu0 %v130_v41 }
  0x36   :  { %362 = vmatpush.msrb.mxu1 %v486_v9  ;;  %317 = vmatpush.msrb.mxu0 %v136_v48 }
  0x38   :  { %364 = vmatpush.msrb.mxu1 %v488_v10  ;;  %321 = vmatpush.msrb.mxu0 %v142_v57 }
  0x3a   :  { %366 = vmatpush.msrb.mxu1 %v490_v11  ;;  %325 = vmatpush.msrb.mxu0 %v148_v63 }
  0x3c   :  { %368 = vmatpush.msrb.mxu1 %v502_v17  ;;  %329 = vmatpush.msrb.mxu0 %v154_v8 }
  0x3e   :  { %370 = vmatpush.msrb.mxu1 %v511_v20  ;;  %333 = vmatpush.msrb.mxu0 %v160_v31 }
  0x40   :  { %372 = vmatpush.msrb.mxu1 %v537_v32  ;;  %337 = vmatpush.msrb.mxu0 %v166_v36 }
  0x42   :  { %374 = vmatpush.msrb.mxu1 %v556_v44  ;;  %341 = vmatpush.msrb.mxu0 %v172_v49 }
  0x44   :  { %376 = vmatpush.msrb.mxu1 %v561_v46  ;;  %345 = vmatpush.msrb.mxu0 %v178_v56 }
  0x46   :  { %378 = vmatpush.msrb.mxu1 %v573_v52  ;;  %349 = vmatpush.msrb.mxu0 %v184_v2 }
  0x47   :  { %351 = vmatmul.f32.vlgmr.msrb.gmra.mxu0 %v626_v35 }
  0x48   :  { %380 = vmatpush.msrb.mxu1 %v575_v54 }
  0x4a   :  { %382 = vmatpush.msrb.mxu1 %v590_v60 }
  0x4c   :  { %384 = vmatpush.msrb.mxu1 %v609_v12 }
  0x4e   :  { %386 = vmatpush.msrb.mxu1 %v624_v34 }
  0x4f   :  { %388 = vmatmul.f32.vlgmr.msrb.gmra.mxu1 %v626_v35 }
  0xa8   :  { %v89_v4 = vpop.f32.mrf.mxu0 }
  0xa9   :  { %v90_v5 = vadd.f32 %v423_v3, %v89_v4 }
  0xac   :  { %v190_v9 = vpop.f32.mrf.mxu1  ;;  %v283_v15 = vpop.f32.mrf.mxu3 }
  0xad   :  { %v191_v10 = vadd.f32 %v190_v9, %v90_v5 }
  0xae   :  { %v244_v11 = vpop.f32.mrf.mxu2 }
  0xaf   :  { %v245_v14 = vadd.f32 %v244_v11, %v191_v10 }
  0xb1   :  { %v284_v16 = vadd.f32 %v283_v15, %v245_v14 }
  0xc4   :  { %v352_v17 = vpop.f32.mrf.mxu0 }
  0xc5   :  { %v353_v18 = vadd.f32 %v352_v17, %v284_v16 }
  0xcc   :  { %v389_v19 = vpop.f32.mrf.mxu1 }
  0xcd   :  { %v390_v20 = vadd.f32 %v389_v19, %v353_v18 }
  0xcf   :  { %v392_v22 = vand.u32 2147483647, %v390_v20  ;;  %vm411_vm4 = vcmp.ge.f32.partialorder %v390_v20, 0.0 }
  0xd1   :  { %v393_v23 = vsub.f32 0.0, %v392_v22 }
  0xd3   :  { %v394_v24 = vmul.f32 1.442695, %v393_v23 }
  0xd5   :  { %424 = vpow2.f32 %v394_v24 }
  0xdb   :  { %v425_v25 = vpop.eup %424 }
  0xdc   :  { %v396_v26 = vadd.f32 1.0, %v425_v25 }
  0xde   :  { %426 = vrcp.f32 %v396_v26  ;;  %v408_v33 = vand.u32 2147483648, %v396_v26  ;;  %v406_v41 = vand.u32 2147483647, %v396_v26  ;;  %vm402_vm1 = vweird.f32 %v396_v26 }
  0xe0   :  { %v409_v45 = vor.u32 1.1754944e-38, %v408_v33  ;;  %vm407_vm3 = vcmp.eq.f32.partialorder %v406_v41, 8.507059e+37 }
  0xe4   :  { %v427_v27 = vpop.eup %426 }
  0xe5   :  { %v398_v28 = vmul.f32 %v427_v27, %v396_v26  ;;  %vm403_vm0 = vweird.f32 %v427_v27 }
  0xe6   :  { %vm404_vm2 = vmor %vm402_vm1, %vm403_vm0 }
  0xe7   :  { %v399_v32 = vsub.f32 1.0, %v398_v28 }
  0xe9   :  { %v400_v39 = vmul.f32 %v427_v27, %v399_v32 }
  0xeb   :  { %v401_v44 = vadd.f32 %v427_v27, %v400_v39 }
  0xed   :  { %v405_v46 = vsel %vm404_vm2, %v427_v27, %v401_v44 }
  0xee   :  { %v410_v48 = vsel %vm407_vm3, %v409_v45, %v405_v46 }
  0xef   :  { %v412_v51 = vmul.f32 %v425_v25, %v410_v48 }
  0xf1   :  { %v413_v52 = vsel %vm411_vm4, %v410_v48, %v412_v51 }
  0xf2   :  { %414 = vst [vmem:[%s730_s3] sm:$0xff] %v413_v52 }
  0xf3   :  { %419 = vsyncpa [#allocation3], 1 }

</bundles_post_ra>
